<compile_context>
chip_gen: v7x
topology: tpu7x:2x2x1
jax: 0.10.0
libtpu: 0.0.40
codegen_flags: <defaults>
</compile_context>

<pallas_src>
import functools

import jax
import jax.numpy as jnp
import numpy as np
from jax.experimental import pallas as pl
from jax.experimental.pallas import tpu as pltpu

EPS = 1e-5
LANE = 128
ACT_DTYPE = jnp.bfloat16     # MXU operands + inter-pass activation storage
                             # (all stats / BN affine / epilogue math stays f32)


def _round_up(x, m):
    return (x + m - 1) // m * m


def _vmem_limit_bytes():
    # Per-chip scoped-VMEM budget (raise on v5e/v6e's 128 MiB, stay conservative
    # on v7x's 64 MiB).  Per-step working set here is small, so this is headroom.
    try:
        cap = pltpu.get_tpu_info().vmem_capacity_bytes
        return min(cap // 2, 64 * 1024 * 1024)
    except Exception:
        return 32 * 1024 * 1024


_VMEM_LIMIT = _vmem_limit_bytes()
_MOSAIC_ARBITRARY = pltpu.CompilerParams(       # stats accumulate across batch
    dimension_semantics=("arbitrary",), vmem_limit_bytes=_VMEM_LIMIT)
_MOSAIC_PARALLEL = pltpu.CompilerParams(        # independent per-image tiles
    dimension_semantics=("parallel",), vmem_limit_bytes=_VMEM_LIMIT)


# ---------------------------------------------------------------------------
# Pallas kernels
# ---------------------------------------------------------------------------
def _conv_stats_kernel(x_ref, w_ref, acc_ref, sum_ref, sq_ref, *,
                       stride, ho, wo, mppi):
    """One image: 3x3 conv as 9 accumulating bf16 dots (f32 accumulate) from a
    VMEM-resident phase-split padded image, plus per-channel sum / sumsq
    accumulated into resident (1, cp) outputs across the batch grid axis."""
    cp = acc_ref.shape[1]
    acc = jnp.zeros((ho * wo, cp), jnp.float32)
    for py in range(stride):
        for px in range(stride):
            xph = x_ref[0, py * stride + px]          # (hc, wc, cin) bf16
            for dy in range(py, 3, stride):
                for dx in range(px, 3, stride):
                    oy, ox = dy // stride, dx // stride
                    win = xph[oy:oy + ho, ox:ox + wo, :]          # contiguous
                    acc = acc + jnp.dot(win.reshape(ho * wo, win.shape[-1]),
                                        w_ref[dy, dx],
                                        preferred_element_type=jnp.float32)

    @pl.when(pl.program_id(0) == 0)
    def _():
        sum_ref[...] = jnp.zeros_like(sum_ref)
        sq_ref[...] = jnp.zeros_like(sq_ref)

    sum_ref[...] += jnp.sum(acc, axis=0, keepdims=True)
    sq_ref[...] += jnp.sum(acc * acc, axis=0, keepdims=True)

    pad_rows = mppi - ho * wo
    if pad_rows:                                     # per-image row padding (rarely hit)
        acc = jnp.concatenate(
            [acc, jnp.zeros((pad_rows, cp), acc.dtype)], axis=0)
    acc_ref[...] = acc.astype(acc_ref.dtype)         # bf16 inter-pass storage


def _bn_affine(sum_ref, sq_ref, gamma_ref, beta_ref, count):
    """Per-channel FMA coefficients (f32): y = acc * s + t."""
    inv = 1.0 / count
    mean = sum_ref[...] * inv
    var = jnp.maximum(sq_ref[...] * inv - mean * mean, 0.0)       # biased var
    s = gamma_ref[...] * jax.lax.rsqrt(var + EPS)                 # rsqrt -> EUP
    t = beta_ref[...] - mean * s
    return s, t


def _bn_relu_kernel(acc_ref, sum_ref, sq_ref, gamma_ref, beta_ref, out_ref, *, count):
    """y1 = relu(bn1(conv1(x)))  (apply pass, f32 math, bf16 store)."""
    s, t = _bn_affine(sum_ref, sq_ref, gamma_ref, beta_ref, count)
    y = jnp.maximum(acc_ref[...].astype(jnp.float32) * s + t, 0.0)
    out_ref[...] = y.astype(out_ref.dtype)


def _bn_skipconv_relu_kernel(acc_ref, sum_ref, sq_ref, gamma_ref, beta_ref,
                             xs_ref, w3_ref, out_ref, *, count):
    """out = relu(bn2(conv2(y1)) + conv3(x)) -- 1x1 skip (+bias via ones column)
    fused as a small bf16 MXU matmul with unpadded K = cin+1."""
    s, t = _bn_affine(sum_ref, sq_ref, gamma_ref, beta_ref, count)
    skip = jnp.dot(xs_ref[...], w3_ref[...], preferred_element_type=jnp.float32)
    out_ref[...] = jnp.maximum(
        acc_ref[...].astype(jnp.float32) * s + t + skip, 0.0).astype(out_ref.dtype)


def _bn_skipid_relu_kernel(acc_ref, sum_ref, sq_ref, gamma_ref, beta_ref,
                           xs_ref, out_ref, *, count):
    """out = relu(bn2(conv2(y1)) + x) -- identity skip."""
    s, t = _bn_affine(sum_ref, sq_ref, gamma_ref, beta_ref, count)
    out_ref[...] = jnp.maximum(
        acc_ref[...].astype(jnp.float32) * s + t + xs_ref[...].astype(jnp.float32),
        0.0).astype(out_ref.dtype)


# ---------------------------------------------------------------------------
# pallas_call plumbing
# ---------------------------------------------------------------------------
def _conv_stats_call(ph, w_taps, *, stride, ho, wo, mppi):
    n, s2, hc, wc, cin = ph.shape
    cp = w_taps.shape[-1]
    kern = functools.partial(_conv_stats_kernel, stride=stride, ho=ho, wo=wo, mppi=mppi)
    return pl.pallas_call(
        kern,
        out_shape=(jax.ShapeDtypeStruct((n * mppi, cp), ACT_DTYPE),
                   jax.ShapeDtypeStruct((1, cp), jnp.float32),
                   jax.ShapeDtypeStruct((1, cp), jnp.float32)),
        grid=(n,),
        in_specs=[pl.BlockSpec((1, s2, hc, wc, cin), lambda i: (i, 0, 0, 0, 0)),
                  pl.BlockSpec(w_taps.shape, lambda i: (0, 0, 0, 0))],
        out_specs=(pl.BlockSpec((mppi, cp), lambda i: (i, 0)),
                   pl.BlockSpec((1, cp), lambda i: (0, 0)),
                   pl.BlockSpec((1, cp), lambda i: (0, 0))),
        compiler_params=_MOSAIC_ARBITRARY,
    )(ph, w_taps)


def _apply_call(kernel, count, mppi, cp, n, args, row_tiled, out_dtype):
    """BN-apply passes: grid=(N,), one image of rows per step.  `row_tiled[i]`
    marks whether args[i] is tiled along rows or resident (same block every step)."""
    in_specs = []
    for a, tiled in zip(args, row_tiled):
        if tiled:
            in_specs.append(pl.BlockSpec((mppi, a.shape[1]), lambda i: (i, 0)))
        else:
            in_specs.append(pl.BlockSpec(a.shape, lambda i: (0, 0)))
    return pl.pallas_call(
        functools.partial(kernel, count=count),
        out_shape=jax.ShapeDtypeStruct((n * mppi, cp), out_dtype),
        grid=(n,),
        in_specs=in_specs,
        out_specs=pl.BlockSpec((mppi, cp), lambda i: (i, 0)),
        compiler_params=_MOSAIC_PARALLEL,
    )(*args)


# ---------------------------------------------------------------------------
# Glue: phase split / weight layout (plain JAX, no patch-matrix inflation)
# ---------------------------------------------------------------------------
def _phase_split(x_nhwc, stride):
    """Pad spatially by 1 and split into stride x stride phases so every 3x3 tap
    (dy, dx) is a contiguous (ho, wo) window of phase (dy%s, dx%s) at offset
    (dy//s, dx//s).  Same total bytes as the padded input (no im2col inflation)."""
    n, h, w, c = x_nhwc.shape
    s = stride
    xp = jnp.pad(x_nhwc, ((0, 0), (1, 1), (1, 1), (0, 0)))
    ho = (h - 1) // s + 1
    wo = (w - 1) // s + 1
    hc = (h + 2 + s - 1) // s
    wc = (w + 2 + s - 1) // s
    phases = []
    for py in range(s):
        for px in range(s):
            phs = xp[:, py::s, px::s, :]
            phs = jnp.pad(phs, ((0, 0), (0, hc - phs.shape[1]),
                                (0, wc - phs.shape[2]), (0, 0)))
            phases.append(phs)
    return jnp.stack(phases, axis=1), ho, wo          # (n, s*s, hc, wc, c)


def _w_taps(w_oihw, cp):
    """PyTorch [Cout,Cin,3,3] -> [3,3,Cin,cp] (per-tap matrices), Cout padded to
    the 128-lane-dense cp; contraction dim Cin stays unpadded."""
    cout = w_oihw.shape[0]
    wt = jnp.transpose(w_oihw, (2, 3, 1, 0))          # (kh, kw, cin, cout)
    wt = jnp.pad(wt, ((0, 0), (0, 0), (0, 0), (0, cp - cout)))
    return wt.astype(ACT_DTYPE)


def _pad_row(v, cp):
    return jnp.pad(v[None, :].astype(jnp.float32), ((0, 0), (0, cp - v.shape[0])))


def residual_forward(x_nchw, params, *, use_1x1conv, strides):
    x = jnp.transpose(x_nchw, (0, 2, 3, 1)).astype(jnp.float32)   # NCHW -> NHWC
    n, h, w, cin = x.shape
    cout = params["w1"].shape[0]
    cp = _round_up(cout, LANE)

    # ---- pass 1: conv1 (in-kernel im2col) + batch stats ----
    ph1, ho, wo = _phase_split(x.astype(ACT_DTYPE), strides)
    m_img = ho * wo
    mppi = _round_up(m_img, 8)                        # per-image rows, sublane-aligned
    count = float(n * m_img)
    w1t = _w_taps(params["w1"], cp)                   # conv bias cancels in BN -> dropped
    acc1, sum1, sq1 = _conv_stats_call(ph1, w1t, stride=strides, ho=ho, wo=wo, mppi=mppi)

    # ---- pass 2: y1 = relu(bn1(acc1)) ----
    gamma1 = _pad_row(params["gamma1"], cp)
    beta1 = _pad_row(params["beta1"], cp)
    y1 = _apply_call(_bn_relu_kernel, count, mppi, cp, n,
                     (acc1, sum1, sq1, gamma1, beta1),
                     (True, False, False, False, False), ACT_DTYPE)

    # ---- pass 3: conv2 (stride 1, in-kernel im2col) + batch stats ----
    y1_img = y1.reshape(n, mppi, cp)[:, :m_img, :cout].reshape(n, ho, wo, cout)
    ph2, _, _ = _phase_split(y1_img, 1)
    w2t = _w_taps(params["w2"], cp)
    acc2, sum2, sq2 = _conv_stats_call(ph2, w2t, stride=1, ho=ho, wo=wo, mppi=mppi)

    # ---- pass 4: out = relu(bn2(acc2) + skip) ----
    gamma2 = _pad_row(params["gamma2"], cp)
    beta2 = _pad_row(params["beta2"], cp)

    if use_1x1conv:
        # skip = conv3(x) + b3, as [x | 1] @ [[w3],[b3]] inside the kernel (K = cin+1)
        xs = x[:, ::strides, ::strides, :].reshape(n, m_img, cin)
        xs = jnp.concatenate([xs, jnp.ones((n, m_img, 1), jnp.float32)], axis=-1)
        xs = jnp.pad(xs, ((0, 0), (0, mppi - m_img), (0, 0)))
        xs = xs.reshape(n * mppi, cin + 1).astype(ACT_DTYPE)
        w3m = jnp.transpose(params["w3"], (2, 3, 1, 0)).reshape(cin, cout)
        w3b = jnp.concatenate([w3m, params["b3"][None, :]], axis=0)
        w3b = jnp.pad(w3b, ((0, 0), (0, cp - cout))).astype(ACT_DTYPE)
        out = _apply_call(_bn_skipconv_relu_kernel, count, mppi, cp, n,
                          (acc2, sum2, sq2, gamma2, beta2, xs, w3b),
                          (True, False, False, False, False, True, False), jnp.float32)
    else:
        # identity skip (module requires strides == 1 and cin == cout here)
        xs = x.reshape(n, m_img, cin)
        xs = jnp.pad(xs, ((0, 0), (0, mppi - m_img), (0, cp - cin)))
        xs = xs.reshape(n * mppi, cp).astype(ACT_DTYPE)
        out = _apply_call(_bn_skipid_relu_kernel, count, mppi, cp, n,
                          (acc2, sum2, sq2, gamma2, beta2, xs),
                          (True, False, False, False, False, True), jnp.float32)

    out = out.reshape(n, mppi, cp)[:, :m_img, :cout].reshape(n, ho, wo, cout)
    return jnp.transpose(out, (0, 3, 1, 2))           # NHWC -> NCHW


# ---------------------------------------------------------------------------
# Pure-JAX f32 reference (PyTorch-faithful, training-mode BN)
# ---------------------------------------------------------------------------
def residual_reference(x_nchw, params, *, use_1x1conv, strides):
    def conv2d(x, wgt, b, stride, pad):
        y = jax.lax.conv_general_dilated(
            x, wgt, window_strides=(stride, stride),
            padding=((pad, pad), (pad, pad)),
            dimension_numbers=("NCHW", "OIHW", "NCHW"))
        return y + b[None, :, None, None]

    def bn(x, g, be):
        mu = jnp.mean(x, axis=(0, 2, 3), keepdims=True)
        var = jnp.mean((x - mu) ** 2, axis=(0, 2, 3), keepdims=True)
        return (x - mu) * jax.lax.rsqrt(var + EPS) * g[None, :, None, None] \
            + be[None, :, None, None]

    y = jax.nn.relu(bn(conv2d(x_nchw, params["w1"], params["b1"], strides, 1),
                       params["gamma1"], params["beta1"]))
    y = bn(conv2d(y, params["w2"], params["b2"], 1, 1), params["gamma2"], params["beta2"])
    xr = conv2d(x_nchw, params["w3"], params["b3"], strides, 0) if use_1x1conv else x_nchw
    return jax.nn.relu(y + xr)


# ---------------------------------------------------------------------------
if __name__ == "__main__":
    def make_params(key, cin, cout, with_1x1):
        ks = jax.random.split(key, 10)
        p = {
            "w1": jax.random.normal(ks[0], (cout, cin, 3, 3), jnp.float32) * 0.1,
            "b1": jax.random.normal(ks[1], (cout,), jnp.float32) * 0.1,
            "w2": jax.random.normal(ks[2], (cout, cout, 3, 3), jnp.float32) * 0.1,
            "b2": jax.random.normal(ks[3], (cout,), jnp.float32) * 0.1,
            "gamma1": jnp.abs(jax.random.normal(ks[6], (cout,), jnp.float32)) + 0.5,
            "beta1": jax.random.normal(ks[7], (cout,), jnp.float32) * 0.1,
            "gamma2": jnp.abs(jax.random.normal(ks[8], (cout,), jnp.float32)) + 0.5,
            "beta2": jax.random.normal(ks[9], (cout,), jnp.float32) * 0.1,
        }
        if with_1x1:
            p["w3"] = jax.random.normal(ks[4], (cout, cin, 1, 1), jnp.float32) * 0.1
            p["b3"] = jax.random.normal(ks[5], (cout,), jnp.float32) * 0.1
        return p

    key = jax.random.PRNGKey(0)
    k_p1, k_p2, k_x1, k_x2 = jax.random.split(key, 4)

    # Tolerance note: MXU operands and inter-pass activations are bf16 (f32
    # accumulation / stats / BN math); two stacked conv+BN layers compound to a
    # few-percent relative error vs the pure-f32 reference.
    TOL = dict(atol=1e-1, rtol=1e-1)

    # Case 1: Residual(4, 8, use_1x1conv=True, strides=2)
    N, Cin, H, W, Cout, strides = 2, 4, 16, 16, 8, 2
    params1 = make_params(k_p1, Cin, Cout, True)
    x1 = jax.random.normal(k_x1, (N, Cin, H, W), jnp.float32)
    out1 = jax.block_until_ready(
        residual_forward(x1, params1, use_1x1conv=True, strides=strides))
    ref1 = residual_reference(x1, params1, use_1x1conv=True, strides=strides)
    assert out1.shape == ref1.shape == (N, Cout, H // strides, W // strides)
    np.testing.assert_allclose(np.asarray(out1), np.asarray(ref1), **TOL)

    # Case 2: Residual(8, 8) -- identity skip, strides=1
    params2 = make_params(k_p2, 8, 8, False)
    x2 = jax.random.normal(k_x2, (N, 8, H, W), jnp.float32)
    out2 = jax.block_until_ready(
        residual_forward(x2, params2, use_1x1conv=False, strides=1))
    ref2 = residual_reference(x2, params2, use_1x1conv=False, strides=1)
    assert out2.shape == ref2.shape == (N, 8, H, W)
    np.testing.assert_allclose(np.asarray(out2), np.asarray(ref2), **TOL)

    print("KERNEL_OK")
</pallas_src>

<mosaic_0001>
module attributes {stable_mosaic.version = 11 : i64} {
  func.func @_conv_stats_kernel(%arg0: i32, %arg1: memref<1x4x9x9x4xbf16, #tpu.memory_space<vmem>>, %arg2: memref<3x3x4x128xbf16, #tpu.memory_space<vmem>>, %arg3: memref<64x128xbf16, #tpu.memory_space<vmem>>, %arg4: memref<1x128xf32, #tpu.memory_space<vmem>>, %arg5: memref<1x128xf32, #tpu.memory_space<vmem>>) attributes {dimension_semantics = [#tpu.dimension_semantics<arbitrary>], iteration_bounds = array<i64: 2>, scalar_prefetch = 0 : i64, scratch_operands = 0 : i64, tpu.core_type = #tpu.core_type<tc>, window_params = [{transform_indices = @transform_0, window_bounds = array<i64: 1, 4, 9, 9, 4>}, {pipeline_mode = #tpu.pipeline_mode<synchronous>, transform_indices = @transform_1, window_bounds = array<i64: 3, 3, 4, 128>}, {transform_indices = @transform_2, window_bounds = array<i64: 64, 128>}, {pipeline_mode = #tpu.pipeline_mode<synchronous>, transform_indices = @transform_3, window_bounds = array<i64: 1, 128>}, {pipeline_mode = #tpu.pipeline_mode<synchronous>, transform_indices = @transform_4, window_bounds = array<i64: 1, 128>}]} {
    %cst = arith.constant 0.000000e+00 : f32
    %0 = vector.broadcast %cst : f32 to vector<64x128xf32>
    %c0 = arith.constant 0 : index
    %c0_0 = arith.constant 0 : index
    %c0_1 = arith.constant 0 : index
    %c0_2 = arith.constant 0 : index
    %c0_3 = arith.constant 0 : index
    %1 = vector.load %arg1[%c0, %c0_0, %c0_1, %c0_2, %c0_3] : memref<1x4x9x9x4xbf16, #tpu.memory_space<vmem>>, vector<1x1x9x9x4xbf16>
    %2 = vector.shape_cast %1 : vector<1x1x9x9x4xbf16> to vector<9x9x4xbf16>
    %3 = vector.extract_strided_slice %2 {offsets = [0, 0, 0], sizes = [8, 8, 4], strides = [1, 1, 1]} : vector<9x9x4xbf16> to vector<8x8x4xbf16>
    %4 = vector.shape_cast %3 : vector<8x8x4xbf16> to vector<64x4xbf16>
    %c0_4 = arith.constant 0 : index
    %c0_5 = arith.constant 0 : index
    %c0_6 = arith.constant 0 : index
    %c0_7 = arith.constant 0 : index
    %5 = vector.load %arg2[%c0_4, %c0_5, %c0_6, %c0_7] : memref<3x3x4x128xbf16, #tpu.memory_space<vmem>>, vector<1x1x4x128xbf16>
    %6 = vector.shape_cast %5 : vector<1x1x4x128xbf16> to vector<4x128xbf16>
    %cst_8 = arith.constant dense<0.000000e+00> : vector<64x128xf32>
    %7 = tpu.matmul %4, %6, %cst_8 {dimension_numbers = #tpu.dot_dimension_numbers<[1], [0], [0], [1], [0, 0, 1, 1], [], []>} : vector<64x4xbf16>, vector<4x128xbf16>, vector<64x128xf32> -> vector<64x128xf32>
    %8 = arith.addf %0, %7 : vector<64x128xf32>
    %9 = vector.extract_strided_slice %2 {offsets = [0, 1, 0], sizes = [8, 8, 4], strides = [1, 1, 1]} : vector<9x9x4xbf16> to vector<8x8x4xbf16>
    %10 = vector.shape_cast %9 : vector<8x8x4xbf16> to vector<64x4xbf16>
    %c0_9 = arith.constant 0 : index
    %c2 = arith.constant 2 : index
    %c0_10 = arith.constant 0 : index
    %c0_11 = arith.constant 0 : index
    %11 = vector.load %arg2[%c0_9, %c2, %c0_10, %c0_11] : memref<3x3x4x128xbf16, #tpu.memory_space<vmem>>, vector<1x1x4x128xbf16>
    %12 = vector.shape_cast %11 : vector<1x1x4x128xbf16> to vector<4x128xbf16>
    %cst_12 = arith.constant dense<0.000000e+00> : vector<64x128xf32>
    %13 = tpu.matmul %10, %12, %cst_12 {dimension_numbers = #tpu.dot_dimension_numbers<[1], [0], [0], [1], [0, 0, 1, 1], [], []>} : vector<64x4xbf16>, vector<4x128xbf16>, vector<64x128xf32> -> vector<64x128xf32>
    %14 = arith.addf %8, %13 : vector<64x128xf32>
    %15 = vector.extract_strided_slice %2 {offsets = [1, 0, 0], sizes = [8, 8, 4], strides = [1, 1, 1]} : vector<9x9x4xbf16> to vector<8x8x4xbf16>
    %16 = vector.shape_cast %15 : vector<8x8x4xbf16> to vector<64x4xbf16>
    %c2_13 = arith.constant 2 : index
    %c0_14 = arith.constant 0 : index
    %c0_15 = arith.constant 0 : index
    %c0_16 = arith.constant 0 : index
    %17 = vector.load %arg2[%c2_13, %c0_14, %c0_15, %c0_16] : memref<3x3x4x128xbf16, #tpu.memory_space<vmem>>, vector<1x1x4x128xbf16>
    %18 = vector.shape_cast %17 : vector<1x1x4x128xbf16> to vector<4x128xbf16>
    %cst_17 = arith.constant dense<0.000000e+00> : vector<64x128xf32>
    %19 = tpu.matmul %16, %18, %cst_17 {dimension_numbers = #tpu.dot_dimension_numbers<[1], [0], [0], [1], [0, 0, 1, 1], [], []>} : vector<64x4xbf16>, vector<4x128xbf16>, vector<64x128xf32> -> vector<64x128xf32>
    %20 = arith.addf %14, %19 : vector<64x128xf32>
    %21 = vector.extract_strided_slice %2 {offsets = [1, 1, 0], sizes = [8, 8, 4], strides = [1, 1, 1]} : vector<9x9x4xbf16> to vector<8x8x4xbf16>
    %22 = vector.shape_cast %21 : vector<8x8x4xbf16> to vector<64x4xbf16>
    %c2_18 = arith.constant 2 : index
    %c2_19 = arith.constant 2 : index
    %c0_20 = arith.constant 0 : index
    %c0_21 = arith.constant 0 : index
    %23 = vector.load %arg2[%c2_18, %c2_19, %c0_20, %c0_21] : memref<3x3x4x128xbf16, #tpu.memory_space<vmem>>, vector<1x1x4x128xbf16>
    %24 = vector.shape_cast %23 : vector<1x1x4x128xbf16> to vector<4x128xbf16>
    %cst_22 = arith.constant dense<0.000000e+00> : vector<64x128xf32>
    %25 = tpu.matmul %22, %24, %cst_22 {dimension_numbers = #tpu.dot_dimension_numbers<[1], [0], [0], [1], [0, 0, 1, 1], [], []>} : vector<64x4xbf16>, vector<4x128xbf16>, vector<64x128xf32> -> vector<64x128xf32>
    %26 = arith.addf %20, %25 : vector<64x128xf32>
    %c0_23 = arith.constant 0 : index
    %c1 = arith.constant 1 : index
    %c0_24 = arith.constant 0 : index
    %c0_25 = arith.constant 0 : index
    %c0_26 = arith.constant 0 : index
    %27 = vector.load %arg1[%c0_23, %c1, %c0_24, %c0_25, %c0_26] : memref<1x4x9x9x4xbf16, #tpu.memory_space<vmem>>, vector<1x1x9x9x4xbf16>
    %28 = vector.shape_cast %27 : vector<1x1x9x9x4xbf16> to vector<9x9x4xbf16>
    %29 = vector.extract_strided_slice %28 {offsets = [0, 0, 0], sizes = [8, 8, 4], strides = [1, 1, 1]} : vector<9x9x4xbf16> to vector<8x8x4xbf16>
    %30 = vector.shape_cast %29 : vector<8x8x4xbf16> to vector<64x4xbf16>
    %c0_27 = arith.constant 0 : index
    %c1_28 = arith.constant 1 : index
    %c0_29 = arith.constant 0 : index
    %c0_30 = arith.constant 0 : index
    %31 = vector.load %arg2[%c0_27, %c1_28, %c0_29, %c0_30] : memref<3x3x4x128xbf16, #tpu.memory_space<vmem>>, vector<1x1x4x128xbf16>
    %32 = vector.shape_cast %31 : vector<1x1x4x128xbf16> to vector<4x128xbf16>
    %cst_31 = arith.constant dense<0.000000e+00> : vector<64x128xf32>
    %33 = tpu.matmul %30, %32, %cst_31 {dimension_numbers = #tpu.dot_dimension_numbers<[1], [0], [0], [1], [0, 0, 1, 1], [], []>} : vector<64x4xbf16>, vector<4x128xbf16>, vector<64x128xf32> -> vector<64x128xf32>
    %34 = arith.addf %26, %33 : vector<64x128xf32>
    %35 = vector.extract_strided_slice %28 {offsets = [1, 0, 0], sizes = [8, 8, 4], strides = [1, 1, 1]} : vector<9x9x4xbf16> to vector<8x8x4xbf16>
    %36 = vector.shape_cast %35 : vector<8x8x4xbf16> to vector<64x4xbf16>
    %c2_32 = arith.constant 2 : index
    %c1_33 = arith.constant 1 : index
    %c0_34 = arith.constant 0 : index
    %c0_35 = arith.constant 0 : index
    %37 = vector.load %arg2[%c2_32, %c1_33, %c0_34, %c0_35] : memref<3x3x4x128xbf16, #tpu.memory_space<vmem>>, vector<1x1x4x128xbf16>
    %38 = vector.shape_cast %37 : vector<1x1x4x128xbf16> to vector<4x128xbf16>
    %cst_36 = arith.constant dense<0.000000e+00> : vector<64x128xf32>
    %39 = tpu.matmul %36, %38, %cst_36 {dimension_numbers = #tpu.dot_dimension_numbers<[1], [0], [0], [1], [0, 0, 1, 1], [], []>} : vector<64x4xbf16>, vector<4x128xbf16>, vector<64x128xf32> -> vector<64x128xf32>
    %40 = arith.addf %34, %39 : vector<64x128xf32>
    %c0_37 = arith.constant 0 : index
    %c2_38 = arith.constant 2 : index
    %c0_39 = arith.constant 0 : index
    %c0_40 = arith.constant 0 : index
    %c0_41 = arith.constant 0 : index
    %41 = vector.load %arg1[%c0_37, %c2_38, %c0_39, %c0_40, %c0_41] : memref<1x4x9x9x4xbf16, #tpu.memory_space<vmem>>, vector<1x1x9x9x4xbf16>
    %42 = vector.shape_cast %41 : vector<1x1x9x9x4xbf16> to vector<9x9x4xbf16>
    %43 = vector.extract_strided_slice %42 {offsets = [0, 0, 0], sizes = [8, 8, 4], strides = [1, 1, 1]} : vector<9x9x4xbf16> to vector<8x8x4xbf16>
    %44 = vector.shape_cast %43 : vector<8x8x4xbf16> to vector<64x4xbf16>
    %c1_42 = arith.constant 1 : index
    %c0_43 = arith.constant 0 : index
    %c0_44 = arith.constant 0 : index
    %c0_45 = arith.constant 0 : index
    %45 = vector.load %arg2[%c1_42, %c0_43, %c0_44, %c0_45] : memref<3x3x4x128xbf16, #tpu.memory_space<vmem>>, vector<1x1x4x128xbf16>
    %46 = vector.shape_cast %45 : vector<1x1x4x128xbf16> to vector<4x128xbf16>
    %cst_46 = arith.constant dense<0.000000e+00> : vector<64x128xf32>
    %47 = tpu.matmul %44, %46, %cst_46 {dimension_numbers = #tpu.dot_dimension_numbers<[1], [0], [0], [1], [0, 0, 1, 1], [], []>} : vector<64x4xbf16>, vector<4x128xbf16>, vector<64x128xf32> -> vector<64x128xf32>
    %48 = arith.addf %40, %47 : vector<64x128xf32>
    %49 = vector.extract_strided_slice %42 {offsets = [0, 1, 0], sizes = [8, 8, 4], strides = [1, 1, 1]} : vector<9x9x4xbf16> to vector<8x8x4xbf16>
    %50 = vector.shape_cast %49 : vector<8x8x4xbf16> to vector<64x4xbf16>
    %c1_47 = arith.constant 1 : index
    %c2_48 = arith.constant 2 : index
    %c0_49 = arith.constant 0 : index
    %c0_50 = arith.constant 0 : index
    %51 = vector.load %arg2[%c1_47, %c2_48, %c0_49, %c0_50] : memref<3x3x4x128xbf16, #tpu.memory_space<vmem>>, vector<1x1x4x128xbf16>
    %52 = vector.shape_cast %51 : vector<1x1x4x128xbf16> to vector<4x128xbf16>
    %cst_51 = arith.constant dense<0.000000e+00> : vector<64x128xf32>
    %53 = tpu.matmul %50, %52, %cst_51 {dimension_numbers = #tpu.dot_dimension_numbers<[1], [0], [0], [1], [0, 0, 1, 1], [], []>} : vector<64x4xbf16>, vector<4x128xbf16>, vector<64x128xf32> -> vector<64x128xf32>
    %54 = arith.addf %48, %53 : vector<64x128xf32>
    %c0_52 = arith.constant 0 : index
    %c3 = arith.constant 3 : index
    %c0_53 = arith.constant 0 : index
    %c0_54 = arith.constant 0 : index
    %c0_55 = arith.constant 0 : index
    %55 = vector.load %arg1[%c0_52, %c3, %c0_53, %c0_54, %c0_55] : memref<1x4x9x9x4xbf16, #tpu.memory_space<vmem>>, vector<1x1x9x9x4xbf16>
    %56 = vector.shape_cast %55 : vector<1x1x9x9x4xbf16> to vector<9x9x4xbf16>
    %57 = vector.extract_strided_slice %56 {offsets = [0, 0, 0], sizes = [8, 8, 4], strides = [1, 1, 1]} : vector<9x9x4xbf16> to vector<8x8x4xbf16>
    %58 = vector.shape_cast %57 : vector<8x8x4xbf16> to vector<64x4xbf16>
    %c1_56 = arith.constant 1 : index
    %c1_57 = arith.constant 1 : index
    %c0_58 = arith.constant 0 : index
    %c0_59 = arith.constant 0 : index
    %59 = vector.load %arg2[%c1_56, %c1_57, %c0_58, %c0_59] : memref<3x3x4x128xbf16, #tpu.memory_space<vmem>>, vector<1x1x4x128xbf16>
    %60 = vector.shape_cast %59 : vector<1x1x4x128xbf16> to vector<4x128xbf16>
    %cst_60 = arith.constant dense<0.000000e+00> : vector<64x128xf32>
    %61 = tpu.matmul %58, %60, %cst_60 {dimension_numbers = #tpu.dot_dimension_numbers<[1], [0], [0], [1], [0, 0, 1, 1], [], []>} : vector<64x4xbf16>, vector<4x128xbf16>, vector<64x128xf32> -> vector<64x128xf32>
    %62 = arith.addf %54, %61 : vector<64x128xf32>
    %c0_i32 = arith.constant 0 : i32
    %63 = arith.cmpi eq, %arg0, %c0_i32 : i32
    %64 = arith.extui %63 : i1 to i32
    %c0_i32_61 = arith.constant 0 : i32
    %65 = arith.cmpi ne, %64, %c0_i32_61 : i32
    scf.if %65 {
      %cst_74 = arith.constant 0.000000e+00 : f32
      %79 = vector.broadcast %cst_74 : f32 to vector<1x128xf32>
      %c0_75 = arith.constant 0 : index
      %c0_76 = arith.constant 0 : index
      %80 = vector.load %arg4[%c0_75, %c0_76] : memref<1x128xf32, #tpu.memory_space<vmem>>, vector<1x128xf32>
      tpu.vector_store %arg4[%c0_75, %c0_76], %79 {strides = array<i32>} : memref<1x128xf32, #tpu.memory_space<vmem>>, vector<1x128xf32>,
      %cst_77 = arith.constant 0.000000e+00 : f32
      %81 = vector.broadcast %cst_77 : f32 to vector<1x128xf32>
      %c0_78 = arith.constant 0 : index
      %c0_79 = arith.constant 0 : index
      %82 = vector.load %arg5[%c0_78, %c0_79] : memref<1x128xf32, #tpu.memory_space<vmem>>, vector<1x128xf32>
      tpu.vector_store %arg5[%c0_78, %c0_79], %81 {strides = array<i32>} : memref<1x128xf32, #tpu.memory_space<vmem>>, vector<1x128xf32>,
    } else {
    }
    %c0_62 = arith.constant 0 : index
    %c0_63 = arith.constant 0 : index
    %66 = vector.load %arg4[%c0_62, %c0_63] : memref<1x128xf32, #tpu.memory_space<vmem>>, vector<1x128xf32>
    %cst_64 = arith.constant dense<0.000000e+00> : vector<128xf32>
    %67 = vector.multi_reduction <add>, %62, %cst_64 [0] : vector<64x128xf32> to vector<128xf32>
    %68 = vector.shape_cast %67 : vector<128xf32> to vector<1x128xf32>
    %69 = arith.addf %66, %68 : vector<1x128xf32>
    %c0_65 = arith.constant 0 : index
    %c0_66 = arith.constant 0 : index
    %70 = vector.load %arg4[%c0_65, %c0_66] : memref<1x128xf32, #tpu.memory_space<vmem>>, vector<1x128xf32>
    tpu.vector_store %arg4[%c0_65, %c0_66], %69 {strides = array<i32>} : memref<1x128xf32, #tpu.memory_space<vmem>>, vector<1x128xf32>,
    %c0_67 = arith.constant 0 : index
    %c0_68 = arith.constant 0 : index
    %71 = vector.load %arg5[%c0_67, %c0_68] : memref<1x128xf32, #tpu.memory_space<vmem>>, vector<1x128xf32>
    %72 = arith.mulf %62, %62 : vector<64x128xf32>
    %cst_69 = arith.constant dense<0.000000e+00> : vector<128xf32>
    %73 = vector.multi_reduction <add>, %72, %cst_69 [0] : vector<64x128xf32> to vector<128xf32>
    %74 = vector.shape_cast %73 : vector<128xf32> to vector<1x128xf32>
    %75 = arith.addf %71, %74 : vector<1x128xf32>
    %c0_70 = arith.constant 0 : index
    %c0_71 = arith.constant 0 : index
    %76 = vector.load %arg5[%c0_70, %c0_71] : memref<1x128xf32, #tpu.memory_space<vmem>>, vector<1x128xf32>
    tpu.vector_store %arg5[%c0_70, %c0_71], %75 {strides = array<i32>} : memref<1x128xf32, #tpu.memory_space<vmem>>, vector<1x128xf32>,
    %77 = arith.truncf %62 : vector<64x128xf32> to vector<64x128xbf16>
    %c0_72 = arith.constant 0 : index
    %c0_73 = arith.constant 0 : index
    %78 = vector.load %arg3[%c0_72, %c0_73] : memref<64x128xbf16, #tpu.memory_space<vmem>>, vector<64x128xbf16>
    tpu.vector_store %arg3[%c0_72, %c0_73], %77 {strides = array<i32>} : memref<64x128xbf16, #tpu.memory_space<vmem>>, vector<64x128xbf16>,
    return
  }
  func.func @transform_0(%arg0: i32) -> (i32, i32, i32, i32, i32) {
    %c0_i32 = arith.constant 0 : i32
    %c0_i32_0 = arith.constant 0 : i32
    %c0_i32_1 = arith.constant 0 : i32
    %c0_i32_2 = arith.constant 0 : i32
    %c0_i32_3 = arith.constant 0 : i32
    return %arg0, %c0_i32, %c0_i32_0, %c0_i32_1, %c0_i32_2 : i32, i32, i32, i32, i32
  }
  func.func @transform_1(%arg0: i32) -> (i32, i32, i32, i32) {
    %c0_i32 = arith.constant 0 : i32
    %c0_i32_0 = arith.constant 0 : i32
    %c0_i32_1 = arith.constant 0 : i32
    %c0_i32_2 = arith.constant 0 : i32
    %c0_i32_3 = arith.constant 0 : i32
    return %c0_i32, %c0_i32_0, %c0_i32_1, %c0_i32_2 : i32, i32, i32, i32
  }
  func.func @transform_2(%arg0: i32) -> (i32, i32) {
    %c0_i32 = arith.constant 0 : i32
    %c0_i32_0 = arith.constant 0 : i32
    return %arg0, %c0_i32 : i32, i32
  }
  func.func @transform_3(%arg0: i32) -> (i32, i32) {
    %c0_i32 = arith.constant 0 : i32
    %c0_i32_0 = arith.constant 0 : i32
    %c0_i32_1 = arith.constant 0 : i32
    return %c0_i32, %c0_i32_0 : i32, i32
  }
  func.func @transform_4(%arg0: i32) -> (i32, i32) {
    %c0_i32 = arith.constant 0 : i32
    %c0_i32_0 = arith.constant 0 : i32
    %c0_i32_1 = arith.constant 0 : i32
    return %c0_i32, %c0_i32_0 : i32, i32
  }
}

</mosaic_0001>

<bundles_post_ra>
// kernel: tpu_custom_call.1
= control target key start
LH: loop header
LB: loop body
LE: loop exit
PB: predicated region body
PF: predicated region fallthrough
CT: control target
= control target key end

     0   :  { %10 = vsyncpa [#allocation3], 0  ;;  %s2696_s0 = inlined_call_operand.vmem [shape: bf16[2,4,9,9,4], index: 0, kind: input, shape index: {}]   ;;  %s2697_s1 = inlined_call_operand.vmem [shape: bf16[3,3,4,128], index: 1, kind: input, shape index: {}]   ;;  %s2698_s2 = inlined_call_operand.hbm [shape: bf16[128,128], index: 2, kind: output, shape index: {0}]   ;;  %s2699_s3 = inlined_call_operand.hbm [shape: f32[1,128], index: 3, kind: output, shape index: {1}]   ;;  %s2700_s4 = inlined_call_operand.hbm [shape: f32[1,128], index: 4, kind: output, shape index: {2}]  }
   0x1   :  { %12 = vsyncpa [#allocation3 + $0x1], 0 }
   0x2   :  { %13 = vsyncpa [#allocation5], 0  ;;  %s2222_s15 = smov 0   ;;  %s2224_s16 = smov 0  }
   0x3   :  { %s2226_s17 = smov 0   ;;  %s2228_s18 = smov 0  }
   0x4 LB: > { %s2243_s19 = sadd.s32 4294967295, %s2189_s18   ;;  %s1610_s20 = sadd.s32 4294967294, %s2189_s18   ;;  %s2189_s18 = sphi %s2228_s18, %s2708_s18   ;;  %s2185_s17 = sphi %s2226_s17, %s2707_s17   ;;  %s2181_s16 = sphi %s2224_s16, %s2706_s16   ;;  %s2177_s15 = sphi %s2222_s15, %s2705_s15  }
   0x5   : > { %s2247_s21 = sadd.s32 1, %s2189_s18   ;;  %s73_s22 = sadd.s32 1, %s2185_s17 }
   0x6   : > { %s70_s23 = ssub.s32 %s2189_s18, %s2247_s21  ;;  %p83_p0 = scmp.ne.s32.totalorder %s2185_s17, %s2181_s16 }
   0x7   : > { %p71_p1 = scmp.eq.s32.totalorder %s70_s23, 0  ;;  %p84_p2 = scmp.eq.s32.totalorder %s2243_s19, 1 }
   0x8   : > { %p89_p3 = scmp.ne.s32.totalorder %s2181_s16, %s2177_s15  ;;  %p90_p4 = scmp.eq.s32.totalorder %s1610_s20, 1 }
   0x9   : > { %s2258_s24 = scalar_select %p71_p1, %s2185_s17, %s73_s22  }
   0xa   : > { %p2262_p5 = por %p84_p2, %p83_p0  ;;  %p2266_p6 = por %p90_p4, %p89_p3 }
   0xb   : > { %p1613_p7 = scmp.ge.s32.totalorder %s2189_s18, 1  ;;  %p161_p8 = scmp.lt.s32.totalorder %s2189_s18, 3 }
   0xd   : > { %p162_p9 = pnand %p1613_p7, %p161_p8 }
   0xe   : > { %vm355_vm0 = vcmask (!%p162_p9), 1041408   ;;  %v2275_v0 = vld [vmem:[%s2697_s1 + $0x2] sm:$0x3] (!%p162_p9)  ;;  %p187_p10 = scmp.lt.s32.totalorder (!%p162_p9), %s2243_s19, 1  ;;  %s180_s29 = sand.u32 (!%p162_p9), 1, %s2181_s16   ;;  %vm342_vm1 = vcmask (!%p162_p9), 31744  }
   0xf   : > { %165 = sbr.rel (%p162_p9) target bundleno = 412 (0x19c), region = 28  ;;  %1984 = vmatprep.subr.msk.bf16.mxu0 (!%p162_p9), %vm355_vm0, %v2275_v0  ;;  %v2283_v1 = vsel (!%p162_p9), %vm355_vm0, %v2275_v0, 0  ;;  %s2287_s30 = sshll.u32 (!%p162_p9), %s180_s29, 5  ;;  %v1616_v2 = vld [vmem:[%s2697_s1 + $0x4] sm:$0x3] (!%p162_p9) }
  0x10   : > { %1865 = vmatpush3.bf16.msra.mxu0 (!%p162_p9), %v2283_v1  ;;  %1980 = vmatprep.subr.msk.bf16.mxu1 (!%p162_p9), %vm355_vm0, %v1616_v2  ;;  %v357_v3 = vsel (!%p162_p9), %vm355_vm0, %v1616_v2, 0  ;;  %v212_v4 = vld [vmem:[%s2697_s1] sm:$0x3] (!%p162_p9)  ;;  %v1669_v5 = vld [vmem:[%s2697_s1 + $0xe] sm:$0x3] (!%p162_p9)  ;;  %s182_s11 = scalar_lea.vmem (!%p162_p9), [#allocation2], %s2287_s30 }
  0x11   : > { %1825 = vmatpush3.bf16.msra.mxu1 (!%p162_p9), %v357_v3  ;;  %1986 = vmatprep.subr.msk.bf16.mxu0 (!%p162_p9), %vm355_vm0, %v1669_v5  ;;  %vm213_vm2 = vsmask.f32 (!%p162_p9), 3328  ;;  %v870_v13 = vsel (!%p162_p9), %vm355_vm0, %v1669_v5, 0  ;;  %v1694_v20 = vld [vmem:[%s2697_s1 + $0x6] sm:$0x3] (!%p162_p9)  ;;  %v2340_v23 = vsel (!%p162_p9), %vm355_vm0, %v212_v4, 0 }
  0x12   : > { %1981 = vmatprep.subr.msk.bf16.mxu1 (!%p162_p9), %vm355_vm0, %v212_v4  ;;  %vm214_vm3 = vsmask.f32 (!%p162_p9), 7440  ;;  %p1729_p11 = scmp.ne.s32.totalorder (!%p162_p9), %s2243_s19, 0 }
  0x13   : > { %vm2362_vm4 = vmor (!%p162_p9), %vm213_vm2, %vm214_vm3 }
  0x16   : > { %s188_s7 = scalar_select %p187_p10, %s2243_s19, 1 }
  0x18   : > { %s1990_s12 = smul.u32 288, %s188_s7 }
  0x1a   : > { %s2307_s20 = scalar_lea.vmem %s2696_s0, %s1990_s12 }
  0x1b   : > { %v1651_v6 = vld [vmem:[%s2307_s20 + $0x48] sm:$0xf]  ;;  %v1652_v7 = vld [vmem:[%s2307_s20 + $0x50] sm:$0xf]  ;;  %v1653_v8 = vld [vmem:[%s2307_s20 + $0x58] sm:$0xf] }
  0x1c   : > { %v2313_v9 = vld [vmem:[%s2307_s20 + $0x60] sm:$0xf]  ;;  %v2316_v10 = vld [vmem:[%s2307_s20 + $0x68] sm:$0xf]  ;;  %v1661_v11 = vcombine.low %v1651_v6, %v1652_v7  ;;  %v1670_v12 = vcombine.low %v1652_v7, %v1653_v8  ;;  %v195_v16 = vld [vmem:[%s2307_s20 + $0x4] sm:$0x1] }
  0x1d   : > { %v1662_v14 = vcombine.low %v1653_v8, %v2313_v9  ;;  %v2321_v15 = vld [vmem:[%s2307_s20] sm:$0xf]  ;;  %v2325_v17 = vld [vmem:[%s2307_s20 + $0x8] sm:$0xf]  ;;  %v197_v18 = vld [vmem:[%s2307_s20 + $0xc] sm:$0x1]  ;;  %v1671_v21 = vcombine.low %v2313_v9, %v2316_v10 }
  0x1e   : > { %1866 = vmatprep.mubr.msk.bf16.mxu0 %vm342_vm1, %v1661_v11  ;;  %v2330_v19 = vld [vmem:[%s2307_s20 + $0x10] sm:$0xf]  ;;  %v199_v22 = vld [vmem:[%s2307_s20 + $0x14] sm:$0x1]  ;;  %v2343_v24 = vld [vmem:[%s2307_s20 + $0x18] sm:$0xf] }
  0x1f   : > { %1867 = vmatmul.mubr.msk.bf16.vlgmr.msra.gmra.mrb[0].mxu0 %vm342_vm1, %v1662_v14  ;;  %v217_v25 = vshrl.u32 %v2321_v15, 16  ;;  %v220_v26 = vshll.u32 %v2321_v15, 16  ;;  %v226_v27 = vshll.u32 %v195_v16, 16  ;;  %v231_v28 = vshrl.u32 %v2325_v17, 16  ;;  %v201_v29 = vld [vmem:[%s2307_s20 + $0x1c] sm:$0x1] }
  0x20   : > { %1875 = vmatpush3.bf16.msra.mxu0 %v870_v13  ;;  %1876 = vmatprep.mubr.msk.bf16.mxu0 %vm342_vm1, %v1670_v12  ;;  %v234_v30 = vshll.u32 %v2325_v17, 16  ;;  %v240_v31 = vshll.u32 %v197_v18, 16  ;;  %v245_v32 = vshrl.u32 %v2330_v19, 16  ;;  %v248_v33 = vshll.u32 %v2330_v19, 16  ;;  %v2355_v34 = vld [vmem:[%s2307_s20 + $0x20] sm:$0xf] }
  0x21   : > { %1987 = vmatprep.subr.msk.bf16.mxu0 %vm355_vm0, %v1694_v20  ;;  %v219_v35 = vrot.slane %v217_v25, 4  ;;  %v222_v36 = vrot.slane %v220_v26, 5  ;;  %v228_v37 = vrot.slane %v226_v27, 5  ;;  %v233_v38 = vrot.slane %v231_v28, 4  ;;  %v203_v47 = vld [vmem:[%s2307_s20 + $0x24] sm:$0x1] }
  0x22   : > { %v236_v39 = vrot.slane %v234_v30, 5  ;;  %v242_v40 = vrot.slane %v240_v31, 5  ;;  %v247_v41 = vrot.slane %v245_v32, 4  ;;  %v250_v42 = vrot.slane %v248_v33, 5  ;;  %v2368_v57 = vld [vmem:[%s2307_s20 + $0x28] sm:$0xf] }
  0x23   : > { %v223_v43 = vor.u32 %v222_v36, %v219_v35  ;;  %v254_v44 = vshll.u32 %v199_v22, 16  ;;  %v259_v45 = vshrl.u32 %v2343_v24, 16  ;;  %v262_v46 = vshll.u32 %v2343_v24, 16  ;;  %v205_v4 = vld [vmem:[%s2307_s20 + $0x2c] sm:$0x1] }
  0x24   : > { %v237_v49 = vor.u32 %v236_v39, %v233_v38  ;;  %v251_v50 = vor.u32 %v250_v42, %v247_v41  ;;  %v268_v51 = vshll.u32 %v201_v29, 16  ;;  %v273_v52 = vshrl.u32 %v2355_v34, 16  ;;  %v2381_v8 = vld [vmem:[%s2307_s20 + $0x30] sm:$0xf]  ;;  %v207_v18 = vld [vmem:[%s2307_s20 + $0x34] sm:$0x1] }
  0x25   : > { %v224_v53 = vrot.slane %v223_v43, 4  ;;  %v256_v54 = vrot.slane %v254_v44, 5  ;;  %v261_v55 = vrot.slane %v259_v45, 4  ;;  %v264_v56 = vrot.slane %v262_v46, 5  ;;  %v1703_v22 = vld [vmem:[%s2697_s1 + $0xa] sm:$0x3] }
  0x26   : > { %v238_v58 = vrot.slane %v237_v49, 4  ;;  %v252_v59 = vrot.slane %v251_v50, 4  ;;  %v270_v60 = vrot.slane %v268_v51, 5  ;;  %v275_v61 = vrot.slane %v273_v52, 4  ;;  %v2398_v28 = vld [vmem:[%s2307_s20 + $0x38] sm:$0xf] }
  0x27   : > { %v229_v62 = vsel %vm2362_vm4, %v224_v53, %v228_v37  ;;  %v265_v63 = vor.u32 %v264_v56, %v261_v55  ;;  %v276_v2 = vshll.u32 %v2355_v34, 16  ;;  %v282_v3 = vshll.u32 %v203_v47, 16  ;;  %v209_v31 = vld [vmem:[%s2307_s20 + $0x3c] sm:$0x1]  ;;  %v1633_v32 = vld [vmem:[%s2697_s1 + $0xc] sm:$0x3] }
  0x28   : > { %v2376_v5 = vsel %vm2362_vm4, %v238_v58, %v242_v40  ;;  %v287_v6 = vshrl.u32 %v2368_v57, 16  ;;  %v290_v7 = vshll.u32 %v2368_v57, 16  ;;  %v997_v11 = vsel %vm355_vm0, %v1694_v20, 0  ;;  %v2414_v38 = vld [vmem:[%s2307_s20 + $0x70] sm:$0xf] }
  0x29   : > { %v2386_v12 = vsel %vm2362_vm4, %v252_v59, %v256_v54  ;;  %v266_v13 = vrot.slane %v265_v63, 4  ;;  %v278_v14 = vrot.slane %v276_v2, 5  ;;  %v1617_v16 = vcombine.low %v229_v62, %v2376_v5  ;;  %v2417_v39 = vld [vmem:[%s2307_s20 + $0x78] sm:$0xf]  ;;  %v2422_v44 = vld [vmem:[%s2307_s20 + $0x80] sm:$0xf] }
  0x2a   : > { %v284_v25 = vrot.slane %v282_v3, 5  ;;  %v289_v20 = vrot.slane %v287_v6, 4  ;;  %v292_v26 = vrot.slane %v290_v7, 5  ;;  %v296_v27 = vshll.u32 %v205_v4, 16  ;;  %v1659_v49 = vld [vmem:[%s2307_s20 + $0x88] sm:$0xf] }
  0x2b   : > { %1877 = vmatmul.mubr.msk.bf16.vlgmr.msra.gmra.mrb[0].mxu0 %vm342_vm1, %v1671_v21  ;;  %v2402_v29 = vsel %vm2362_vm4, %v266_v13, %v270_v60  ;;  %v279_v30 = vor.u32 %v278_v14, %v275_v61  ;;  %1826 = vmatprep.mubr.msk.bf16.mxu1 %vm342_vm1, %v1617_v16  ;;  %v301_v9 = vshrl.u32 %v2381_v8, 16  ;;  %v304_v21 = vshll.u32 %v2381_v8, 16  ;;  %v1678_v54 = vld [vmem:[%s2307_s20 + $0x90] sm:$0xf]  ;;  %v1680_v55 = vld [vmem:[%s2307_s20 + $0x98] sm:$0xf] }
  0x2c   : > { %1885 = vmatpush3.bf16.msra.mxu0 %v997_v11  ;;  %v1618_v33 = vcombine.low %v2386_v12, %v2402_v29  ;;  %v293_v35 = vor.u32 %v292_v26, %v289_v20  ;;  %v298_v36 = vrot.slane %v296_v27, 5  ;;  %v310_v37 = vshll.u32 %v207_v18, 16  ;;  %v1682_v63 = vld [vmem:[%s2307_s20 + $0xa0] sm:$0xf]  ;;  %v1684_v2 = vld [vmem:[%s2307_s20 + $0xa8] sm:$0xf] }
  0x2d   : > { %1988 = vmatprep.subr.msk.bf16.mxu0 %vm355_vm0, %v1703_v22  ;;  %v280_v40 = vrot.slane %v279_v30, 4  ;;  %v303_v41 = vrot.slane %v301_v9, 4  ;;  %v306_v42 = vrot.slane %v304_v21, 5  ;;  %v315_v43 = vshrl.u32 %v2398_v28, 16  ;;  %v1686_v16 = vld [vmem:[%s2307_s20 + $0xb0] sm:$0xf] }
  0x2e   : > { %1827 = vmatmul.mubr.msk.bf16.vlgmr.msra.gmra.mrb[0].mxu1 %vm342_vm1, %v1618_v33  ;;  %v294_v45 = vrot.slane %v293_v35, 4  ;;  %v318_v46 = vshll.u32 %v2398_v28, 16  ;;  %v324_v47 = vshll.u32 %v209_v31, 16  ;;  %v1672_v53 = vcombine.low %v2414_v38, %v2417_v39  ;;  %v1688_v27 = vld [vmem:[%s2307_s20 + $0xb8] sm:$0xf] }
  0x2f   : > { %v2429_v50 = vsel %vm2362_vm4, %v280_v40, %v284_v25  ;;  %1835 = vmatpush3.bf16.msra.mxu1 %v2340_v23  ;;  %v307_v51 = vor.u32 %v306_v42, %v303_v41  ;;  %v317_v52 = vrot.slane %v315_v43, 4  ;;  %v312_v58 = vrot.slane %v310_v37, 5 }
  0x30   : > { %v2438_v56 = vsel %vm2362_vm4, %v294_v45, %v298_v36  ;;  %v320_v59 = vrot.slane %v318_v46, 5  ;;  %1982 = vmatprep.subr.msk.bf16.mxu1 %vm355_vm0, %v1633_v32  ;;  %1880 = vmatprep.mubr.msk.bf16.mxu0 %vm342_vm1, %v1672_v53  ;;  %v1664_v61 = vcombine.low %v2417_v39, %v2422_v44  ;;  %v1673_v62 = vcombine.low %v2422_v44, %v1659_v49  ;;  %v1679_v49 = vld [vmem:[%s2307_s20 + $0x94] sm:$0x1] }
  0x31   : > { %v1619_v60 = vcombine.low %v2429_v50, %v2438_v56  ;;  %v308_v23 = vrot.slane %v307_v51, 4  ;;  %v326_v4 = vrot.slane %v324_v47, 5  ;;  %v2450_v6 = vsel %vm355_vm0, %v1633_v32, 0  ;;  %v2467_v32 = vld [vmem:[%s2307_s20 + $0xc0] sm:$0xf] }
  0x32   : > { %v321_v3 = vor.u32 %v320_v59, %v317_v52  ;;  %v1695_v7 = vcombine.low %v1678_v54, %v1680_v55  ;;  %v1073_v11 = vshrl.u32 %v1678_v54, 16  ;;  %v1076_v13 = vshll.u32 %v1678_v54, 16  ;;  %v2482_v51 = vld [vmem:[%s2697_s1 + $0x8] sm:$0x3] }
  0x33   : > { %1830 = vmatprep.mubr.msk.bf16.mxu1 %vm342_vm1, %v1619_v60  ;;  %1881 = vmatmul.mubr.msk.bf16.gmra.mrb[4].mxu0 %vm342_vm1, %v1673_v62  ;;  %v1087_v14 = vshrl.u32 %v1680_v55, 16  ;;  %v1211_v18 = vsel %vm355_vm0, %v1703_v22, 0  ;;  %v2458_v25 = vsel %vm2362_vm4, %v308_v23, %v312_v58  ;;  %v1090_v26 = vshll.u32 %v1680_v55, 16  ;;  %v2470_v22 = vld [vmem:[%s2307_s20 + $0xc8] sm:$0xf] }
  0x34   : > { %v322_v20 = vrot.slane %v321_v3, 4  ;;  %1886 = vmatprep.mubr.msk.bf16.mxu0 %vm342_vm1, %v1695_v7  ;;  %v1625_v30 = vcombine.low %v2321_v15, %v2325_v17  ;;  %v1626_v31 = vcombine.low %v2330_v19, %v2343_v24  ;;  %v1696_v9 = vcombine.low %v1682_v63, %v1684_v2  ;;  %v1681_v62 = vld [vmem:[%s2307_s20 + $0x9c] sm:$0x1]  ;;  %v1683_v7 = vld [vmem:[%s2307_s20 + $0xa4] sm:$0x1] }
  0x35   : > { %v1101_v21 = vshrl.u32 %v1682_v63, 16  ;;  %v1104_v35 = vshll.u32 %v1682_v63, 16  ;;  %v1115_v36 = vshrl.u32 %v1684_v2, 16  ;;  %v1118_v37 = vshll.u32 %v1684_v2, 16 }
  0x36   : > { %v2474_v33 = vsel %vm2362_vm4, %v322_v20, %v326_v4  ;;  %v1075_v40 = vrot.slane %v1073_v11, 4  ;;  %v1078_v41 = vrot.slane %v1076_v13, 5  ;;  %v1089_v42 = vrot.slane %v1087_v14, 4  ;;  %v1685_v20 = vld [vmem:[%s2307_s20 + $0xac] sm:$0x1] }
  0x37   : > { %v1620_v15 = vcombine.low %v2458_v25, %v2474_v33  ;;  %v1092_v43 = vrot.slane %v1090_v26, 5  ;;  %v1697_v45 = vcombine.low %v1686_v16, %v1688_v27  ;;  %v1129_v46 = vshrl.u32 %v1686_v16, 16 }
  0x38   : > { %v1132_v47 = vshll.u32 %v1686_v16, 16  ;;  %v1103_v52 = vrot.slane %v1101_v21, 4  ;;  %v1627_v53 = vcombine.low %v2355_v34, %v2368_v57  ;;  %v1143_v54 = vshrl.u32 %v1688_v27, 16 }
  0x39   : > { %1831 = vmatmul.mubr.msk.bf16.gmra.mrb[4].mxu1 %vm342_vm1, %v1620_v15  ;;  %v1146_v55 = vshll.u32 %v1688_v27, 16  ;;  %v1106_v58 = vrot.slane %v1104_v35, 5  ;;  %v1117_v59 = vrot.slane %v1115_v36, 4  ;;  %v1120_v60 = vrot.slane %v1118_v37, 5 }
  0x3a   : > { %1836 = vmatprep.mubr.msk.bf16.mxu1 %vm342_vm1, %v1625_v30  ;;  %v1698_v23 = vcombine.low %v2467_v32, %v2470_v22  ;;  %v1131_v63 = vrot.slane %v1129_v46, 4  ;;  %v1134_v2 = vrot.slane %v1132_v47, 5  ;;  %v1157_v3 = vshrl.u32 %v2467_v32, 16  ;;  %v1687_v46 = vld [vmem:[%s2307_s20 + $0xb4] sm:$0x1] }
  0x3b   : > { %1887 = vmatmul.mubr.msk.bf16.vlgmr.msra.gmra.mrb[0].mxu0 %vm342_vm1, %v1696_v9  ;;  %v1160_v4 = vshll.u32 %v2467_v32, 16  ;;  %v1145_v11 = vrot.slane %v1143_v54, 4  ;;  %v1148_v13 = vrot.slane %v1146_v55, 5  ;;  %v1171_v14 = vshrl.u32 %v2470_v22, 16  ;;  %v1689_v55 = vld [vmem:[%s2307_s20 + $0xbc] sm:$0x1] }
  0x3c   : > { %1890 = vmatprep.mubr.msk.bf16.mxu0 %vm342_vm1, %v1697_v45  ;;  %1895 = vmatpush3.bf16.msra.mxu0 %v1211_v18  ;;  %v1079_v16 = vor.u32 %v1078_v41, %v1075_v40  ;;  %v1174_v26 = vshll.u32 %v2470_v22, 16  ;;  %v1082_v27 = vshll.u32 %v1679_v49, 16  ;;  %v1093_v30 = vor.u32 %v1092_v43, %v1089_v42  ;;  %v1642_v18 = vld [vmem:[%s2697_s1 + $0x10] sm:$0x3] }
  0x3d   : > { %v1096_v9 = vshll.u32 %v1681_v62, 16  ;;  %1989 = vmatprep.subr.msk.bf16.mxu0 %vm355_vm0, %v2482_v51  ;;  %v1107_v32 = vor.u32 %v1106_v58, %v1103_v52  ;;  %v1110_v35 = vshll.u32 %v1683_v7, 16  ;;  %v1121_v36 = vor.u32 %v1120_v60, %v1117_v59  ;;  %v1691_v7 = vld [vmem:[%s2307_s20 + $0xc4] sm:$0x1] }
  0x3e   : > { %v1080_v21 = vrot.slane %v1079_v16, 4  ;;  %v1084_v37 = vrot.slane %v1082_v27, 5  ;;  %v1094_v15 = vrot.slane %v1093_v30, 4  ;;  %v1124_v22 = vshll.u32 %v1685_v20, 16  ;;  %v1693_v16 = vld [vmem:[%s2307_s20 + $0xcc] sm:$0x1] }
  0x3f   : > { %v1098_v40 = vrot.slane %v1096_v9, 5  ;;  %v1159_v41 = vrot.slane %v1157_v3, 4  ;;  %v1108_v42 = vrot.slane %v1107_v32, 4  ;;  %v1112_v43 = vrot.slane %v1110_v35, 5 }
  0x40   : > { %v1122_v45 = vrot.slane %v1121_v36, 4  ;;  %v1162_v47 = vrot.slane %v1160_v4, 5  ;;  %v1085_v49 = vsel %vm2362_vm4, %v1080_v21, %v1084_v37  ;;  %v1126_v54 = vrot.slane %v1124_v22, 5 }
  0x41   : > { %1837 = vmatmul.mubr.msk.bf16.vlgmr.msra.gmra.mrb[0].mxu1 %vm342_vm1, %v1626_v31  ;;  %v1099_v52 = vsel %vm2362_vm4, %v1094_v15, %v1098_v40  ;;  %v1173_v58 = vrot.slane %v1171_v14, 4  ;;  %v1176_v59 = vrot.slane %v1174_v26, 5  ;;  %v1634_v31 = vcombine.low %v2325_v17, %v2330_v19 }
  0x42   : > { %1845 = vmatpush3.bf16.msra.mxu1 %v2450_v6  ;;  %1840 = vmatprep.mubr.msk.bf16.mxu1 %vm342_vm1, %v1627_v53  ;;  %v1704_v60 = vcombine.low %v1085_v49, %v1099_v52  ;;  %v1135_v62 = vor.u32 %v1134_v2, %v1131_v63  ;;  %v1138_v3 = vshll.u32 %v1687_v46, 16  ;;  %v1149_v4 = vor.u32 %v1148_v13, %v1145_v11  ;;  %v210_v46 = vld [vmem:[%s2307_s20 + $0x40] sm:$0xf]  ;;  %v211_v52 = vld [vmem:[%s2307_s20 + $0x44] sm:$0x1] }
  0x43   : > { %1891 = vmatmul.mubr.msk.bf16.gmra.mrb[4].mxu0 %vm342_vm1, %v1698_v23  ;;  %1983 = vmatprep.subr.msk.bf16.mxu1 %vm355_vm0, %v1642_v18  ;;  %v1628_v6 = vcombine.low %v2381_v8, %v2398_v28  ;;  %v1113_v53 = vsel %vm2362_vm4, %v1108_v42, %v1112_v43  ;;  %v1127_v23 = vsel %vm2362_vm4, %v1122_v45, %v1126_v54  ;;  %v1152_v14 = vshll.u32 %v1689_v55, 16  ;;  %v2066_v45 = vld [vmem:[%s2307_s20 + $0xd8] ss:$8 sps:$4 sm:$0xff]  }
  0x44   : > { %1896 = vmatprep.mubr.msk.bf16.mxu0 %vm342_vm1, %v1704_v60  ;;  %v1136_v17 = vrot.slane %v1135_v62, 4  ;;  %v1140_v19 = vrot.slane %v1138_v3, 5  ;;  %v1150_v20 = vrot.slane %v1149_v4, 4  ;;  %v1163_v63 = vor.u32 %v1162_v47, %v1159_v41  ;;  %v2068_v54 = vld [vmem:[%s2307_s20 + $0xf8] ss:$8 sps:$4 sm:$0xff]  }
  0x45   : > { %v1154_v2 = vrot.slane %v1152_v14, 5  ;;  %v1166_v11 = vshll.u32 %v1691_v7, 16  ;;  %v1177_v13 = vor.u32 %v1176_v59, %v1173_v58  ;;  %v1180_v26 = vshll.u32 %v1693_v16, 16  ;;  %v2069_v59 = vld [vmem:[%s2307_s20 + $0x108] ss:$8 sps:$4 sm:$0xff]  }
  0x46   : > { %v1705_v27 = vcombine.low %v1113_v53, %v1127_v23  ;;  %v1141_v30 = vsel %vm2362_vm4, %v1136_v17, %v1140_v19  ;;  %v1164_v9 = vrot.slane %v1163_v63, 4  ;;  %v1330_v15 = vsel %vm355_vm0, %v2482_v51, 0 }
  0x47   : > { %v1155_v21 = vsel %vm2362_vm4, %v1150_v20, %v1154_v2  ;;  %v1168_v32 = vrot.slane %v1166_v11, 5  ;;  %v1178_v35 = vrot.slane %v1177_v13, 4  ;;  %v1182_v36 = vrot.slane %v1180_v26, 5 }
  0x48   : > { %v1706_v37 = vcombine.low %v1141_v30, %v1155_v21  ;;  %v1635_v41 = vcombine.low %v2343_v24, %v2355_v34  ;;  %v1636_v42 = vcombine.low %v2368_v57, %v2381_v8  ;;  %v654_v51 = vsel %vm355_vm0, %v1642_v18, 0  ;;  %v2067_v18 = vld [vmem:[%s2307_s20 + $0xe8] ss:$8 sps:$4 sm:$0xff]  }
  0x49   : > { %1841 = vmatmul.mubr.msk.bf16.gmra.mrb[4].mxu1 %vm342_vm1, %v1628_v6  ;;  %v1169_v40 = vsel %vm2362_vm4, %v1164_v9, %v1168_v32  ;;  %v1183_v22 = vsel %vm2362_vm4, %v1178_v35, %v1182_v36  ;;  %v621_v47 = vshrl.u32 %v210_v46, 16  ;;  %v624_v49 = vshll.u32 %v210_v46, 16 }
  0x4a   : > { %1846 = vmatprep.mubr.msk.bf16.mxu1 %vm342_vm1, %v1634_v31  ;;  %v1707_v43 = vcombine.low %v1169_v40, %v1183_v22  ;;  %v1637_v24 = vcombine.low %v2398_v28, %v210_v46  ;;  %v1643_v34 = vcombine.low %v2376_v5, %v2386_v12  ;;  %v630_v58 = vshll.u32 %v211_v52, 16 }
  0x4b   : > { %1897 = vmatmul.mubr.msk.bf16.vlgmr.msra.gmra.mrb[0].mxu0 %vm342_vm1, %v1705_v27  ;;  %v623_v57 = vrot.slane %v621_v47, 4  ;;  %v626_v8 = vrot.slane %v624_v49, 5  ;;  %v1645_v5 = vcombine.low %v2438_v56, %v2458_v25  ;;  %v2191_v2 = vmov (!%p1729_p11), 0.0  }
  0x4c   : > { %1900 = vmatprep.mubr.msk.bf16.mxu0 %vm342_vm1, %v1706_v37  ;;  %1905 = vmatpush3.bf16.msra.mxu0 %v1330_v15  ;;  %v632_v28 = vrot.slane %v630_v58, 5  ;;  %1409 = vst [vmem:[#allocation4] sm:$0x1] (!%p1729_p11), %v2191_v2  ;;  %1410 = vst [vmem:[#allocation6] sm:$0x1] (!%p1729_p11), %v2191_v2 }
  0x4d   : > { %v627_v55 = vor.u32 %v626_v8, %v623_v57 }
  0x4f   : > { %v628_v12 = vrot.slane %v627_v55, 4 }
  0x51   : > { %1847 = vmatmul.mubr.msk.bf16.vlgmr.msra.gmra.mrb[0].mxu1 %vm342_vm1, %v1635_v41  ;;  %v633_v60 = vsel %vm2362_vm4, %v628_v12, %v632_v28 }
  0x52   : > { %1855 = vmatpush3.bf16.msra.mxu1 %v654_v51  ;;  %1850 = vmatprep.mubr.msk.bf16.mxu1 %vm342_vm1, %v1636_v42  ;;  %v1646_v31 = vcombine.low %v2474_v33, %v633_v60 }
  0x53   : > { %1901 = vmatmul.mubr.msk.bf16.gmra.mrb[4].mxu0 %vm342_vm1, %v1707_v43  ;;  %1985 = vmatprep.subr.msk.bf16.mxu1 %vm355_vm0, %v2275_v0  ;;  %v1644_v0 = vcombine.low %v2402_v29, %v2429_v50  ;;  %v1663_v29 = vcombine.low %v2316_v10, %v2414_v38 }
  0x54   : > { %1906 = vmatprep.mubr.msk.bf16.mxu0 %vm342_vm1, %v2066_v45 }
  0x59   : > { %1851 = vmatmul.mubr.msk.bf16.gmra.mrb[4].mxu1 %vm342_vm1, %v1637_v24 }
  0x5a   : > { %1856 = vmatprep.mubr.msk.bf16.mxu1 %vm342_vm1, %v1643_v34 }
  0x5b   : > { %1907 = vmatmul.mubr.msk.bf16.vlgmr.msra.gmra.mrb[0].mxu0 %vm342_vm1, %v2067_v18 }
  0x5c   : > { %1910 = vmatprep.mubr.msk.bf16.mxu0 %vm342_vm1, %v2068_v54 }
  0x61   : > { %1857 = vmatmul.mubr.msk.bf16.vlgmr.msra.gmra.mrb[0].mxu1 %vm342_vm1, %v1644_v0 }
  0x62   : > { %1915 = vmatpush3.bf16.msra.mxu1 %v2283_v1  ;;  %1860 = vmatprep.mubr.msk.bf16.mxu1 %vm342_vm1, %v1645_v5 }
  0x63   : > { %1911 = vmatmul.mubr.msk.bf16.gmra.mrb[4].mxu0 %vm342_vm1, %v2069_v59 }
  0x69   : > { %1861 = vmatmul.mubr.msk.bf16.gmra.mrb[4].mxu1 %vm342_vm1, %v1646_v31 }
  0x6a   : > { %1870 = vmatprep.mubr.msk.bf16.mxu1 %vm342_vm1, %v1663_v29 }
  0x75   : > { %1871 = vmatmul.mubr.msk.bf16.vlgmr.msra.gmra.mrb[4].mxu1 %vm342_vm1, %v1664_v61 }
 0x12e   : > { %v1908_v1 = vpop.f32.mrb[0].mxu0 }
 0x12f   : > { %v1366_v50 = vpop.f32.mrb[1].mxu0 }
 0x130   : > { %v1909_v48 = vpop.f32.mrb[2].mxu0 }
 0x131   : > { %v1369_v56 = vpop.f32.mrb[3].mxu0 }
 0x134   : > { %v1858_v25 = vpop.f32.mrb[0].mxu1 }
 0x135   : > { %v690_v62 = vpop.f32.mrb[1].mxu1  ;;  %v1916_v3 = vadd.f32 %v1908_v1, %v1858_v25 }
 0x136   : > { %v1859_v33 = vpop.f32.mrb[2].mxu1  ;;  %v1917_v4 = vadd.f32 %v1366_v50, %v690_v62  ;;  %v1912_v10 = vpop.f32.mrb[4].mxu0 }
 0x137   : > { %v693_v38 = vpop.f32.mrb[3].mxu1  ;;  %v1918_v7 = vadd.f32 %v1909_v48, %v1859_v33  ;;  %v1382_v16 = vpop.f32.mrb[5].mxu0 }
 0x138   : > { %v1919_v6 = vadd.f32 %v1369_v56, %v693_v38  ;;  %v1913_v53 = vpop.f32.mrb[6].mxu0 }
 0x139   : > { %v1385_v23 = vpop.f32.mrb[7].mxu0 }
 0x146   : > { %1408 = sbr.rel (%p1729_p11) target bundleno = 333 (0x14d), region = 32 }
 0x148   : > { %v1872_v39 = vpop.f32.mrb[4].mxu1 }
 0x149   : > { %v2583_v44 = vadd.f32 %v1912_v10, %v1872_v39  ;;  %v826_v61 = vpop.f32.mrb[5].mxu1 }
 0x14a   : > { %v1921_v14 = vadd.f32 %v1382_v16, %v826_v61  ;;  %v1873_v17 = vpop.f32.mrb[6].mxu1 }
 0x14b   : > { %v2585_v19 = vadd.f32 %v1913_v53, %v1873_v17  ;;  %v829_v20 = vpop.f32.mrb[7].mxu1 }
 0x14c   : > { %v1923_v63 = vadd.f32 %v1385_v23, %v829_v20 }
 0x14d PF: > { %v1412_v11 = vadd.f32 %v1919_v6, %v1917_v4  ;;  %v1428_v13 = vmul.f32 %v1917_v4, %v1917_v4  ;;  %v1429_v26 = vmul.f32 %v1919_v6, %v1919_v6  ;;  %v1430_v27 = vmul.f32 %v1916_v3, %v1916_v3  ;;  %s1755_s12 = sshll.u32 %s2243_s19, 9  ;;  %s1505_s20 = sshll.u32 %s182_s11, 4  ;;  %s2597_s20 = int_to_ptr.vmem [resolvable:$true] %s1505_s20 }
 0x14e   : > { %v1431_v9 = vmul.f32 %v1918_v7, %v1918_v7  ;;  %v1759_v32 = vpack.c.bf16 %v1919_v6, %v1917_v4  ;;  %v1764_v35 = vpack.c.bf16 %v1918_v7, %v1916_v3  ;;  %v1769_v36 = vpack.c.bf16 %v1923_v63, %v1921_v14  ;;  %s2595_s14 = scalar_lea.hbm %s2698_s2, %s1755_s12  ;;  %s2601_s22 = scalar_lea.sflag [#allocation3], %s180_s29 }
 0x14f   : > { %v1413_v30 = vadd.f32 %v1916_v3, %v1412_v11  ;;  %v1436_v21 = vadd.f32 %v1429_v26, %v1428_v13  ;;  %v1774_v37 = vpack.c.bf16 %v2585_v19, %v2583_v44  ;;  %v1432_v40 = vmul.f32 %v1921_v14, %v1921_v14  ;;  %s2071_s23 = scalar_lea.vmem %s2597_s20, 512  ;;  %s2192_s27 = smov [#allocation2]  }
 0x150   : > { %1760 = vst [vmem:[%s182_s11] sm:$0xff] %v1759_v32   ;;  %1776 = vst [vmem:[%s182_s11 + $0x8] sm:$0xff] %v1764_v35   ;;  %v1433_v42 = vmul.f32 %v1923_v63, %v1923_v63  ;;  %p2072_p12 = scmp.ne.s32.totalorder %s2597_s20, %s2071_s23  ;;  %s2075_s28 = sshll.u32 %s2192_s27, 4  ;;  %s2076_s28 = int_to_ptr.vmem [resolvable:$false] %s2075_s28 }
 0x151   : > { %v1414_v15 = vadd.f32 %v1918_v7, %v1413_v30  ;;  %v1437_v22 = vadd.f32 %v1436_v21, %v1430_v27  ;;  %1777 = vst [vmem:[%s182_s11 + $0x10] sm:$0xff] %v1769_v36   ;;  %1778 = vst [vmem:[%s182_s11 + $0x18] sm:$0xff] %v1774_v37   ;;  %s2077_s5 = scalar_lea.vmem %s2076_s28, 1024  ;;  %p2078_p1 = scmp.lt.s32.totalorder %s2597_s20, %s2076_s28 }
 0x152   : > { %p2073_p13 = pnand %p2072_p12, %p2262_p5  ;;  %p2079_p3 = scmp.lt.s32.totalorder %s2077_s5, %s2071_s23 }
 0x153   : > { %v1415_v41 = vadd.f32 %v1921_v14, %v1414_v15  ;;  %v1438_v51 = vadd.f32 %v1437_v22, %v1431_v9 }
 0x154   : > { %p2074_p0 = pneg %p2073_p13  ;;  %p2080_p4 = por %p2079_p3, %p2078_p1 }
 0x156   : > { %p2081_p7 = pnand %p2080_p4, %p2074_p0 }
 0x158   : > { %2084 = shalt.err (!%p2081_p7)
}
 0x159   : > { %s2085_s29 = scalar_lea.hbm %s2595_s14, 512  ;;  %s2089_s8 = scalar_lea.hbm %s2698_s2, 1024 }
 0x15a   : > { %p2086_p8 = scmp.ne.s32.totalorder %s2595_s14, %s2085_s29  ;;  %p2090_p11 = scmp.lt.u32.totalorder %s2595_s14, %s2698_s2 }
 0x15b   : > { %p2091_p12 = scmp.lt.u32.totalorder %s2089_s8, %s2085_s29  ;;  %p2093_p0 = scmp.lt.u32.totalorder %s2085_s29, %s2595_s14 }
 0x15c   : > { %p2087_p9 = pnand %p2086_p8, %p2262_p5 }
 0x15d   : > { %p2092_p13 = por %p2091_p12, %p2090_p11 }
 0x15e   : > { %p2088_p10 = pneg %p2087_p9 }
 0x15f   : > { %p2094_p1 = por %p2093_p0, %p2092_p13 }
 0x161   : > { %p2095_p3 = pnand %p2094_p1, %p2088_p10 }
 0x163   : > { %2098 = shalt.err (!%p2095_p3)
}
 0x164   : > { %s2193_s11 = smov 64   ;;  %s2194_s12 = smov 4   ;;  %v1416_v43 = vadd.f32 %v1923_v63, %v1415_v41  ;;  %v1434_v45 = vmul.f32 %v2583_v44, %v2583_v44  ;;  %v1439_v46 = vadd.f32 %v1438_v51, %v1432_v40  ;;  %v1435_v49 = vmul.f32 %v2585_v19, %v2585_v19  ;;  %v1411_v59 = vld [vmem:[#allocation4] sm:$0x1]  ;;  %v1427_v29 = vld [vmem:[#allocation6] sm:$0x1] }
 0x165   : > { %1991 = dma.vmem_to_hbm [thread:$0]  (%p2262_p5), %s2597_s20, 512, %s2595_s14, %s2601_s22, %s2193_s11, %s2193_s11, %s2194_s12  }
 0x166   : > { %v1417_v47 = vadd.f32 %v2583_v44, %v1416_v43  ;;  %v1440_v24 = vadd.f32 %v1439_v46, %v1433_v42  ;;  %s2195_s25 = smov [#allocation4]   ;;  %s2196_s13 = smov [#allocation6]  }
 0x167   : > { %s1519_s30 = sshll.u32 %s2195_s25, 4  ;;  %s1530_s14 = sshll.u32 %s2196_s13, 4  ;;  %s1520_s30 = int_to_ptr.vmem [resolvable:$true] %s1519_s30  ;;  %s2631_s14 = int_to_ptr.vmem [resolvable:$true] %s1530_s14 }
 0x168   : > { %v1418_v34 = vadd.f32 %v2585_v19, %v1417_v47  ;;  %v1441_v57 = vadd.f32 %v1440_v24, %v1434_v45  ;;  %s2099_s20 = scalar_lea.vmem %s1520_s30, 16  ;;  %s2105_s22 = scalar_lea.vmem %s1520_s30, 32 }
 0x169   : > { %p2100_p5 = scmp.ne.s32.totalorder %s1520_s30, %s2099_s20  ;;  %p2106_p8 = scmp.lt.s32.totalorder %s1520_s30, %s1520_s30 }
 0x16a   : > { %v1419_v8 = vrot.slane %v1418_v34, 4  ;;  %v1442_v18 = vadd.f32 %v1441_v57, %v1435_v49  ;;  %p2107_p9 = scmp.lt.s32.totalorder %s2105_s22, %s2099_s20 }
 0x16b   : > { %p2101_p4 = pnand %p2100_p5, %p84_p2 }
 0x16c   : > { %v1420_v52 = vadd.f32 %v1419_v8, %v1418_v34  ;;  %v1443_v54 = vrot.slane %v1442_v18, 4  ;;  %p2108_p10 = por %p2107_p9, %p2106_p8 }
 0x16d   : > { %p2102_p7 = pneg %p2101_p4 }
 0x16e   : > { %v1421_v55 = vrot.slane %v1420_v52, 2  ;;  %v1444_v58 = vadd.f32 %v1443_v54, %v1442_v18 }
 0x16f   : > { %p2109_p11 = pnand %p2108_p10, %p2102_p7 }
 0x170   : > { %v1422_v0 = vadd.f32 %v1421_v55, %v1420_v52  ;;  %v1445_v5 = vrot.slane %v1444_v58, 2 }
 0x172   : > { %v1423_v12 = vrot.slane %v1422_v0, 1  ;;  %v1446_v28 = vadd.f32 %v1445_v5, %v1444_v58 }
 0x174   : > { %v1424_v60 = vadd.f32 %v1423_v12, %v1422_v0  ;;  %v1447_v31 = vrot.slane %v1446_v28, 1 }
 0x176   : > { %v1425_v1 = vadd.f32 %v1424_v60, %v1411_v59  ;;  %v1448_v50 = vadd.f32 %v1447_v31, %v1446_v28 }
 0x178   : > { %1426 = vst [vmem:[#allocation4] sm:$0x1] %v1425_v1  ;;  %v1449_v48 = vadd.f32 %v1448_v50, %v1427_v29 }
 0x179   : > { %2112 = shalt.err (!%p2109_p11)
}
 0x17a   : > { %s2113_s28 = scalar_lea.hbm %s2699_s3, 16 }
 0x17b   : > { %p2114_p12 = scmp.ne.s32.totalorder %s2699_s3, %s2113_s28  ;;  %p2119_p1 = scmp.lt.u32.totalorder %s2113_s28, %s2699_s3 }
 0x17d   : > { %p2115_p13 = pnand %p2114_p12, %p84_p2 }
 0x17f   : > { %p2116_p0 = pneg %p2115_p13 }
 0x181   : > { %p2121_p3 = pnand %p2119_p1, %p2116_p0 }
 0x183   : > { %2124 = shalt.err (!%p2121_p3)
}
 0x184   : > { %1993 = dma.vmem_to_hbm [thread:$0]  (%p84_p2), %s1520_s30, 16, %s2699_s3, [#allocation5]   ;;  %1450 = vst [vmem:[#allocation6] sm:$0x1] %v1449_v48 }
 0x185   : > { %s2125_s10 = scalar_lea.vmem %s2631_s14, 16  ;;  %s2131_s11 = scalar_lea.vmem %s2631_s14, 32 }
 0x186   : > { %p2126_p5 = scmp.ne.s32.totalorder %s2631_s14, %s2125_s10  ;;  %p2132_p8 = scmp.lt.s32.totalorder %s2631_s14, %s2631_s14 }
 0x187   : > { %p2133_p9 = scmp.lt.s32.totalorder %s2131_s11, %s2125_s10 }
 0x188   : > { %p2127_p4 = pnand %p2126_p5, %p84_p2 }
 0x189   : > { %p2134_p10 = por %p2133_p9, %p2132_p8 }
 0x18a   : > { %p2128_p7 = pneg %p2127_p4 }
 0x18c   : > { %p2135_p11 = pnand %p2134_p10, %p2128_p7 }
 0x18e   : > { %2138 = shalt.err (!%p2135_p11)
}
 0x18f   : > { %s2139_s13 = scalar_lea.hbm %s2700_s4, 16 }
 0x190   : > { %p2140_p12 = scmp.ne.s32.totalorder %s2700_s4, %s2139_s13  ;;  %p2145_p1 = scmp.lt.u32.totalorder %s2139_s13, %s2700_s4 }
 0x192   : > { %p2141_p13 = pnand %p2140_p12, %p84_p2 }
 0x194   : > { %p2142_p0 = pneg %p2141_p13 }
 0x196   : > { %p2147_p3 = pnand %p2145_p1, %p2142_p0 }
 0x198   : > { %2150 = shalt.err (!%p2147_p3)
}
 0x199   : > { %1995 = dma.vmem_to_hbm [thread:$0]  (%p84_p2), %s2631_s14, 16, %s2700_s4, [#allocation5]  }
 0x19a   : > { %2168 = dma.done.wait (%p84_p2), [#allocation5], 32  }
 0x19b   : > { %2170 = vsyncadd (%p84_p2), [#allocation5], 4294967264 }
 0x19c PF: > { %p2009_p5 = scmp.ge.s32.totalorder %s2189_s18, 2  ;;  %s1550_s5 = sand.u32 1, %s2177_s15  }
 0x19d   : > { %s1551_s29 = scalar_lea.sflag [#allocation3], %s1550_s5 }
 0x19e   : > { %p2002_p4 = pnand %p2009_p5, %p2266_p6 }
 0x1a0   : > { %2172 = dma.done.wait (!%p2002_p4), %s1551_s29, 512  }
 0x1a1   : > { %2174 = vsyncadd (!%p2002_p4), %s1551_s29, 4294966784  ;;  %p16_p7 = scmp.ge.s32.totalorder %s2247_s21, 4   ;;  %s2705_s15 = smov %s2181_s16 }
 0x1a2   : > { %s2706_s16 = smov %s2185_s17  ;;  %s2707_s17 = smov %s2258_s24 }
 0x1a3   : > { %s2708_s18 = smov %s2247_s21  ;;  %18 = sbr.rel (!%p16_p7) target bundleno = 4 (0x4), region = 94 }
 0x1aa   :  { %1556 = vsyncpa [#allocation3], 1 }
 0x1ab   :  { %1558 = vsyncpa [#allocation3 + $0x1], 1 }
 0x1ac   :  { %1559 = vsyncpa [#allocation5], 1 }

</bundles_post_ra>
